<compile_context>
chip_gen: v6e
topology: v6e:2x2x1
jax: 0.10.0
libtpu: 0.0.40
codegen_flags: <defaults>
</compile_context>

<pallas_src>
import math

import jax
import jax.numpy as jnp
from jax.experimental import pallas as pl
from jax.experimental.pallas import tpu as pltpu


def _sinusoidal_kernel(x_ref, w_ref, sin_ref, cos_ref):
    # x_ref: (1, TB)  w_ref: (half_dim, 1)
    # sin_ref/cos_ref: (half_dim, TB)  -- lane-dense slabs, B on lanes.
    x = x_ref[...]                              # (1, TB)
    w = w_ref[...]                              # (half_dim, 1)
    freqs = w * x * (2.0 * math.pi)             # (half_dim, TB), VPU broadcast mul
    sin_ref[...] = jnp.sin(freqs)               # direct aligned slab store
    cos_ref[...] = jnp.cos(freqs)               # direct aligned slab store


def random_or_learned_sinusoidal_pos_emb(x, weights):
    """x: (B,) float32, weights: (half_dim,) float32 -> (B, 2*half_dim + 1)."""
    B = x.shape[0]
    half_dim = weights.shape[0]

    x_row = x.reshape(1, B).astype(jnp.float32)            # B on lanes
    w_col = weights.reshape(half_dim, 1).astype(jnp.float32)

    # Lane tile over B: multiple of 128 for big batches (pipelined, "parallel"
    # across cores); otherwise a single full-extent block (valid block shape).
    if B >= 256:
        tb = 256
    else:
        tb = B
    grid = (pl.cdiv(B, tb),)

    cost = pl.CostEstimate(
        flops=3 * B * half_dim,                 # mul + scale + broadcast work
        transcendentals=2 * B * half_dim,       # sin + cos
        bytes_accessed=4 * (B + half_dim + 2 * half_dim * B),
    )

    sin_t, cos_t = pl.pallas_call(
        _sinusoidal_kernel,
        out_shape=(
            jax.ShapeDtypeStruct((half_dim, B), jnp.float32),
            jax.ShapeDtypeStruct((half_dim, B), jnp.float32),
        ),
        grid=grid,
        in_specs=[
            pl.BlockSpec((1, tb), lambda i: (0, i)),          # x tile (lanes)
            pl.BlockSpec((half_dim, 1), lambda i: (0, 0)),    # weights (resident)
        ],
        out_specs=(
            pl.BlockSpec((half_dim, tb), lambda i: (0, i)),   # sin slab
            pl.BlockSpec((half_dim, tb), lambda i: (0, i)),   # cos slab
        ),
        compiler_params=pltpu.CompilerParams(
            dimension_semantics=("parallel",),
        ),
        cost_estimate=cost,
    )(x_row, w_col)

    # Splice the raw-x passthrough column back in outside the kernel; XLA fuses
    # this cheap concat/transpose with whatever consumes the embedding.
    x_col = x.reshape(B, 1).astype(jnp.float32)
    return jnp.concatenate([x_col, sin_t.T, cos_t.T], axis=-1)


def _reference(x, weights):
    x2d = x.reshape(-1, 1).astype(jnp.float32)
    freqs = x2d * weights.reshape(1, -1).astype(jnp.float32) * 2.0 * math.pi
    return jnp.concatenate([x2d, jnp.sin(freqs), jnp.cos(freqs)], axis=-1)


if __name__ == "__main__":
    key = jax.random.PRNGKey(0)
    k_x, k_w = jax.random.split(key)

    dim = 16                      # must be even; half_dim = 8
    half_dim = dim // 2
    B = 8

    # Deterministic "parameter" init (mirrors torch.randn(half_dim)).
    weights = jax.random.normal(k_w, (half_dim,), dtype=jnp.float32)
    # Example timesteps.
    x = jax.random.uniform(k_x, (B,), dtype=jnp.float32) * 1000.0

    out = random_or_learned_sinusoidal_pos_emb(x, weights)
    out = jax.block_until_ready(out)

    ref = _reference(x, weights)
    assert out.shape == (B, dim + 1), out.shape
    assert jnp.allclose(out, ref, atol=1e-5, rtol=1e-5), "mismatch vs reference"

    print("KERNEL_OK")
</pallas_src>

<mosaic_0001>
module attributes {stable_mosaic.version = 11 : i64} {
  func.func @_sinusoidal_kernel(%arg0: i32, %arg1: memref<1x8xf32, #tpu.memory_space<vmem>>, %arg2: memref<8x1xf32, #tpu.memory_space<vmem>>, %arg3: memref<8x8xf32, #tpu.memory_space<vmem>>, %arg4: memref<8x8xf32, #tpu.memory_space<vmem>>) attributes {dimension_semantics = [#tpu.dimension_semantics<parallel>], iteration_bounds = array<i64: 1>, scalar_prefetch = 0 : i64, scratch_operands = 0 : i64, tpu.core_type = #tpu.core_type<tc>, window_params = [{transform_indices = @transform_0, window_bounds = array<i64: 1, 8>}, {pipeline_mode = #tpu.pipeline_mode<synchronous>, transform_indices = @transform_1, window_bounds = array<i64: 8, 1>}, {transform_indices = @transform_2, window_bounds = array<i64: 8, 8>}, {transform_indices = @transform_3, window_bounds = array<i64: 8, 8>}]} {
    %c0 = arith.constant 0 : index
    %c0_0 = arith.constant 0 : index
    %0 = vector.load %arg1[%c0, %c0_0] : memref<1x8xf32, #tpu.memory_space<vmem>>, vector<1x8xf32>
    %c0_1 = arith.constant 0 : index
    %c0_2 = arith.constant 0 : index
    %1 = vector.load %arg2[%c0_1, %c0_2] : memref<8x1xf32, #tpu.memory_space<vmem>>, vector<8x1xf32>
    %2 = vector.broadcast %1 : vector<8x1xf32> to vector<8x8xf32>
    %3 = vector.broadcast %0 : vector<1x8xf32> to vector<8x8xf32>
    %4 = arith.mulf %2, %3 : vector<8x8xf32>
    %cst = arith.constant 6.28318548 : f32
    %5 = vector.broadcast %cst : f32 to vector<8x8xf32>
    %6 = arith.mulf %4, %5 : vector<8x8xf32>
    %7 = math.sin %6 : vector<8x8xf32>
    %c0_3 = arith.constant 0 : index
    %c0_4 = arith.constant 0 : index
    %8 = vector.load %arg3[%c0_3, %c0_4] : memref<8x8xf32, #tpu.memory_space<vmem>>, vector<8x8xf32>
    tpu.vector_store %arg3[%c0_3, %c0_4], %7 {strides = array<i32>} : memref<8x8xf32, #tpu.memory_space<vmem>>, vector<8x8xf32>,
    %9 = math.cos %6 : vector<8x8xf32>
    %c0_5 = arith.constant 0 : index
    %c0_6 = arith.constant 0 : index
    %10 = vector.load %arg4[%c0_5, %c0_6] : memref<8x8xf32, #tpu.memory_space<vmem>>, vector<8x8xf32>
    tpu.vector_store %arg4[%c0_5, %c0_6], %9 {strides = array<i32>} : memref<8x8xf32, #tpu.memory_space<vmem>>, vector<8x8xf32>,
    return
  }
  func.func @transform_0(%arg0: i32) -> (i32, i32) {
    %c0_i32 = arith.constant 0 : i32
    %c0_i32_0 = arith.constant 0 : i32
    return %c0_i32, %arg0 : i32, i32
  }
  func.func @transform_1(%arg0: i32) -> (i32, i32) {
    %c0_i32 = arith.constant 0 : i32
    %c0_i32_0 = arith.constant 0 : i32
    %c0_i32_1 = arith.constant 0 : i32
    return %c0_i32, %c0_i32_0 : i32, i32
  }
  func.func @transform_2(%arg0: i32) -> (i32, i32) {
    %c0_i32 = arith.constant 0 : i32
    %c0_i32_0 = arith.constant 0 : i32
    return %c0_i32, %arg0 : i32, i32
  }
  func.func @transform_3(%arg0: i32) -> (i32, i32) {
    %c0_i32 = arith.constant 0 : i32
    %c0_i32_0 = arith.constant 0 : i32
    return %c0_i32, %arg0 : i32, i32
  }
}

</mosaic_0001>

<bundles_post_ra>
// kernel: tpu_custom_call.1
= control target key start
LH: loop header
LB: loop body
LE: loop exit
PB: predicated region body
PF: predicated region fallthrough
CT: control target
= control target key end

     0   :  { %9 = vsyncpa [#allocation3], 0  ;;  %v339_v1 = vmov 0   ;;  %s403_s0 = inlined_call_operand.vmem [shape: f32[1,8], index: 0, kind: input, shape index: {}]   ;;  %s404_s1 = inlined_call_operand.vmem [shape: f32[8,1], index: 1, kind: input, shape index: {}]   ;;  %s405_s2 = inlined_call_operand.hbm [shape: f32[8,8], index: 2, kind: output, shape index: {0}]   ;;  %s406_s3 = inlined_call_operand.hbm [shape: f32[8,8], index: 3, kind: output, shape index: {1}]  }
   0x1   :  { %v16_v0 = vld [vmem:[%s404_s1] sm:$0xff]  ;;  %290 = vset.pattern.permute.xlu0 %v339_v1 }
   0x2   :  { %19 = vperm.xlu0 %290, %v16_v0  }
   0x3   :  { %10 = vsyncpa [#allocation5], 0  ;;  %v268_v2 = vld [vmem:[%s403_s0] ss:$0 sm:$0xff]  ;;  %v340_v16 = vmov 683565275  }
   0x4   :  { %v341_v18 = vmov 2475754826   ;;  %v342_v21 = vmov 2131351028   ;;  %v343_v24 = vmov 2102212464  }
   0x5   :  { %v344_v27 = vmov 920167782   ;;  %v345_v30 = vmov 1326507024   ;;  %vm134_vm10 = vcmask 64512   ;;  %s346_s0 = smov [#allocation2]  }
   0x6   :  { %s246_s1 = sshll.u32 %s346_s0, 4  ;;  %s347_s16 = smov [#allocation4]   ;;  %s247_s1 = int_to_ptr.vmem [resolvable:$true] %s246_s1 }
   0x7   :  { %s256_s17 = sshll.u32 %s347_s16, 4  ;;  %s295_s18 = scalar_lea.vmem %s247_s1, 128  ;;  %s257_s17 = int_to_ptr.vmem [resolvable:$true] %s256_s17 }
   0x8   :  { %p296_p0 = scmp.ne.s32.totalorder %s247_s1, %s295_s18  ;;  %p300_p1 = scmp.lt.s32.totalorder %s247_s1, %s247_s1 }
   0x9   :  { %p301_p2 = scmp.lt.s32.totalorder %s295_s18, %s295_s18 }
   0xb   :  { %p302_p3 = por %p301_p2, %p300_p1 }
   0xd   :  { %p303_p4 = pnand %p302_p3, %p296_p0 }
  0x7d   :  { %v20_v3 = vpop.permute.xlu0 %19 }
  0x7e   :  { %v28_v4 = vmul.f32 %v268_v2, %v20_v3 }
  0x80   :  { %v374_v5 = vmul.f32 6.2831855, %v28_v4 }
  0x82   :  { %v33_v6 = vand.u32 2139095040, %v374_v5  ;;  %v30_v10 = vand.u32 2147483647, %v374_v5  ;;  %vm32_vm7 = vcmp.lt.s32.totalorder %v374_v5, 0 }
  0x84   :  { %v34_v7 = vshrl.u32 %v33_v6, 23  ;;  %v37_v13 = vand.u32 8388607, %v30_v10  ;;  %vm31_vm8 = vcmp.le.f32.partialorder %v30_v10, 0.7853982 }
  0x86   :  { %v269_v8 = vadd.s32 4294967169, %v34_v7  ;;  %v38_v32 = vor.u32 8388608, %v37_v13 }
  0x88   :  { %v40_v9 = vadd.s32 1, %v269_v8  ;;  %v78_v46 = vshll.u32 %v38_v32, 8 }
  0x8a   :  { %vm41_vm0 = vcmp.gt.s32.totalorder %v40_v9, 0 }
  0x8b   :  { %v42_v11 = vsel %vm41_vm0, %v40_v9, 0  ;;  %vm122_vm0 = vweird.f32 %v374_v5 }
  0x8c   :  { %v44_v12 = vand.u32 31, %v42_v11  ;;  %v43_v15 = vshrl.u32 %v42_v11, 5 }
  0x8e   :  { %v45_v14 = vsub.s32 32, %v44_v12  ;;  %v47_v17 = vshll.u32 %v340_v16, %v44_v12  ;;  %v50_v19 = vshll.u32 %v341_v18, %v44_v12  ;;  %v53_v23 = vshll.u32 %v342_v21, %v44_v12 }
  0x8f   :  { %v56_v26 = vshll.u32 %v343_v24, %v44_v12  ;;  %v59_v29 = vshll.u32 %v344_v27, %v44_v12  ;;  %vm62_vm1 = vcmp.lt.s32.totalorder %v43_v15, 1  ;;  %vm65_vm2 = vcmp.lt.s32.totalorder %v43_v15, 4 }
  0x90   :  { %v48_v20 = vshrl.u32 %v341_v18, %v45_v14  ;;  %v51_v22 = vshrl.u32 %v342_v21, %v45_v14  ;;  %v54_v25 = vshrl.u32 %v343_v24, %v45_v14  ;;  %v57_v28 = vshrl.u32 %v344_v27, %v45_v14 }
  0x91   :  { %v60_v31 = vshrl.u32 %v345_v30, %v45_v14  ;;  %v46_v41 = vshrl.u32 %v340_v16, %v45_v14  ;;  %vm64_vm3 = vcmp.lt.s32.totalorder %v43_v15, 3  ;;  %vm63_vm4 = vcmp.lt.s32.totalorder %v43_v15, 2 }
  0x92   :  { %v49_v33 = vor.u32 %v48_v20, %v47_v17  ;;  %v52_v34 = vor.u32 %v51_v22, %v50_v19  ;;  %v55_v35 = vor.u32 %v54_v25, %v53_v23  ;;  %v58_v36 = vor.u32 %v57_v28, %v56_v26 }
  0x93   :  { %v61_v37 = vor.u32 %v60_v31, %v59_v29 }
  0x94   :  { %v67_v38 = vsel %vm65_vm2, %v55_v35, 2102212464  ;;  %v70_v39 = vsel %vm62_vm1, %v49_v33, %v52_v34  ;;  %v74_v40 = vsel %vm62_vm1, %v52_v34, %v55_v35  ;;  %v71_v42 = vsel %vm65_vm2, %v58_v36, 920167782 }
  0x95   :  { %v75_v43 = vsel %vm65_vm2, %v61_v37, 1326507024  ;;  %v72_v44 = vsel %vm64_vm3, %v55_v35, %v71_v42  ;;  %v66_v47 = vsel %vm62_vm1, %v46_v41, %v49_v33  ;;  %v68_v48 = vsel %vm64_vm3, %v52_v34, %v67_v38 }
  0x96   :  { %v76_v45 = vsel %vm64_vm3, %v58_v36, %v75_v43  ;;  %v73_v49 = vsel %vm63_vm4, %v70_v39, %v72_v44  ;;  %v69_v55 = vsel %vm63_vm4, %v66_v47, %v68_v48 }
  0x97   :  { %v77_v50 = vsel %vm63_vm4, %v74_v40, %v76_v45  ;;  %v383_v53 = vmul.u32.u64.low %v78_v46, %v73_v49  ;;  %v384_v54 = vmul.u32.u64.high %v78_v46, %v73_v49, %v383_v53  ;;  %v85_v57 = vmul.u32 %v78_v46, %v69_v55 }
  0x98   :  { %v380_v51 = vmul.u32.u64.low %v78_v46, %v77_v50  ;;  %v381_v52 = vmul.u32.u64.high %v78_v46, %v77_v50, %v380_v51 }
  0x99   :  { %v88_v56 = vadd.s32 1, %v384_v54 }
  0x9a   :  { %vm87_vm5 = vc.u32 %v381_v52, %v383_v53  ;;  %v86_v6 = vadd.s32 %v383_v53, %v381_v52 }
  0x9b   :  { %v89_v58 = vsel %vm87_vm5, %v88_v56, %v384_v54 }
  0x9c   :  { %v90_v59 = vadd.s32 %v89_v58, %v85_v57 }
  0x9e   :  { %v91_v60 = vadd.s32 536870912, %v90_v59 }
  0xa0   :  { %v92_v61 = vshrl.u32 %v91_v60, 30 }
  0xa2   :  { %v93_v62 = vshll.u32 %v92_v61, 30  ;;  %v116_v20 = vsub.s32 4, %v92_v61 }
  0xa4   :  { %v94_v63 = vsub.s32 %v90_v59, %v93_v62  ;;  %v117_v23 = vsel %vm32_vm7, %v116_v20, %v92_v61 }
  0xa5   :  { %v119_v24 = vsel %vm31_vm8, 0, %v117_v23 }
  0xa6   :  { %v96_v0 = vsub.s32 0, %v94_v63  ;;  %v123_v25 = vadd.s32 3, %v119_v24  ;;  %v229_v27 = vand.u32 3, %v119_v24 }
  0xa8   :  { %v270_v1 = vmin.u32 %v96_v0, %v94_v63  ;;  %v124_v26 = vand.u32 3, %v123_v25  ;;  %vm234_vm11 = vcmp.eq.s32.totalorder %v229_v27, 2  ;;  %vm231_vm13 = vcmp.eq.s32.totalorder %v229_v27, 0 }
  0xa9   :  { %vm230_vm15 = vcmp.lt.s32.totalorder %v229_v27, 2 }
  0xaa   :  { %v98_v2 = vclz %v270_v1  ;;  %vm129_vm9 = vcmp.eq.s32.totalorder %v124_v26, 2  ;;  %vm126_vm12 = vcmp.eq.s32.totalorder %v124_v26, 0  ;;  %vm125_vm14 = vcmp.lt.s32.totalorder %v124_v26, 2 }
  0xac   :  { %v271_v3 = vadd.s32 4294967294, %v98_v2 }
  0xae   :  { %vm272_vm6 = vcmp.lt.s32.totalorder %v271_v3, 0 }
  0xaf   :  { %v101_v4 = vsel %vm272_vm6, 0, %v271_v3 }
  0xb0   :  { %v102_v7 = vsub.s32 32, %v101_v4  ;;  %v106_v8 = vsub.s32 4294967266, %v101_v4  ;;  %v103_v9 = vshll.u32 %v94_v63, %v101_v4 }
  0xb2   :  { %v104_v11 = vshrl.u32 %v86_v6, %v102_v7  ;;  %v107_v12 = vadd.s32 127, %v106_v8 }
  0xb4   :  { %v105_v13 = vor.u32 %v104_v11, %v103_v9  ;;  %v108_v14 = vshll.u32 %v107_v12, 23 }
  0xb6   :  { %v109_v15 = vor.u32 4788187, %v108_v14  ;;  %v112_v17 = vcvt.s32.f32 %v105_v13 }
  0xb8   :  { %v110_v16 = vand.u32 2147483647, %v109_v15 }
  0xba   :  { %v113_v18 = vmul.f32 %v112_v17, %v110_v16 }
  0xbc   :  { %v114_v19 = vxor.u32 2147483648, %v113_v18 }
  0xbe   :  { %v115_v21 = vsel %vm32_vm7, %v114_v19, %v113_v18 }
  0xbf   :  { %v118_v22 = vsel %vm31_vm8, %v374_v5, %v115_v21 }
  0xc0   :  { %291 = vcosq.f32 %v118_v22 }
  0xc1   :  { %293 = vsinq.f32 %v118_v22 }
  0xcd   :  { %v292_v28 = vpop.eup %291 }
  0xce   :  { %v294_v29 = vpop.eup %293  ;;  %v130_v30 = vxor.u32 2147483648, %v292_v28 }
  0xcf   :  { %v127_v31 = vxor.u32 2147483648, %v294_v29 }
  0xd0   :  { %v131_v10 = vsel %vm129_vm9, %v130_v30, %v294_v29  ;;  %v236_v32 = vsel %vm234_vm11, %v130_v30, %v294_v29 }
  0xd1   :  { %v128_v33 = vsel %vm126_vm12, %v292_v28, %v127_v31  ;;  %v233_v34 = vsel %vm231_vm13, %v292_v28, %v127_v31 }
  0xd2   :  { %v132_v35 = vsel %vm125_vm14, %v128_v33, %v131_v10  ;;  %v237_v36 = vsel %vm230_vm15, %v233_v34, %v236_v32 }
  0xd3   :  { %v133_v37 = vsel %vm122_vm0, nan, %v132_v35  ;;  %v238_v38 = vsel %vm122_vm0, nan, %v237_v36 }
  0xd4   :  { %135 = vst.msk [vmem:[#allocation2] sm:$0xff] %vm134_vm10, %v133_v37  ;;  %239 = vst.msk [vmem:[#allocation4] sm:$0xff] %vm134_vm10, %v238_v38 }
  0xd5   :  { %306 = shalt.err (!%p303_p4)
}
  0xd6   :  { %249 = dma.vmem_to_hbm [thread:$0]  %s247_s1, 128, %s405_s2, [#allocation3]  }
  0xd7   :  { %s315_s21 = scalar_lea.vmem %s257_s17, 128  ;;  %p320_p6 = scmp.lt.s32.totalorder %s257_s17, %s257_s17 }
  0xd8   :  { %p316_p5 = scmp.ne.s32.totalorder %s257_s17, %s315_s21  ;;  %p321_p7 = scmp.lt.s32.totalorder %s315_s21, %s315_s21 }
  0xda   :  { %p322_p8 = por %p321_p7, %p320_p6 }
  0xdc   :  { %p323_p9 = pnand %p322_p8, %p316_p5 }
  0xde   :  { %326 = shalt.err (!%p323_p9)
}
  0xdf   :  { %259 = dma.vmem_to_hbm [thread:$0]  %s257_s17, 128, %s406_s3, [#allocation5]  }
  0xe0   :  { %335 = dma.done.wait [#allocation3], 128  }
  0xe1   :  { %336 = vsyncadd [#allocation3], 4294967168 }
  0xe2   :  { %337 = dma.done.wait [#allocation5], 128  }
  0xe3   :  { %338 = vsyncadd [#allocation5], 4294967168 }
  0xe4   :  { %266 = vsyncpa [#allocation3], 1 }
  0xe5   :  { %267 = vsyncpa [#allocation5], 1 }

</bundles_post_ra>
